<compile_context>
chip_gen: v5e
topology: v5e:2x2
jax: 0.10.0
libtpu: 0.0.40
codegen_flags: <defaults>
</compile_context>

<pallas_src>
import math
import jax
import jax.numpy as jnp
from jax.experimental import pallas as pl
from jax.experimental.pallas import tpu as pltpu


def _round_up(n, m):
    return ((n + m - 1) // m) * m


def _pick_batch_block(B, bm_target=256):
    """Return (bm, Bp): batch block size and padded batch (Bp % bm == 0)."""
    if B >= bm_target:
        Bp = _round_up(B, bm_target)
        return bm_target, Bp
    Bp = max(8, _round_up(B, 8))
    return Bp, Bp


def _pick_time_block(T, tt_target=8):
    for tt in (tt_target, 8, 4, 2, 1):
        if 1 <= tt <= T and T % tt == 0:
            return tt
    return 1


def _vmem_limit_bytes(est):
    # 2x headroom over the static estimate, clamped to [32 MiB, 56 MiB]
    # (56 MiB keeps us under v7x's 64 MiB physical VMEM).
    return int(min(max(2 * est, 32 * 1024 * 1024), 56 * 1024 * 1024))


def prepare_lstm_params(w_ih, w_hh, b_ih, b_hh, weight_dtype=jnp.bfloat16):
    """One-time host preprocessing of the tied-LSTM parameters.

    w_ih: (4H, I), w_hh: (4H, H), biases: (4H,), gate order [i|f|c|o].
    Gates are padded to Hp = round_up(H, 128) lanes so each gate slice is
    whole-vreg / lane-aligned.  Weights default to bfloat16 (MXU-native with
    f32 accumulation); the bias stays f32 and is added into the accumulator.
    """
    fourH, I = w_ih.shape
    H = fourH // 4
    Hp = max(128, _round_up(H, 128))

    wx = jnp.transpose(w_ih).astype(jnp.float32).reshape(I, 4, H)
    wh = jnp.transpose(w_hh).astype(jnp.float32).reshape(H, 4, H)
    b = (b_ih + b_hh).astype(jnp.float32).reshape(4, H)

    wx_p = jnp.pad(wx, ((0, 0), (0, 0), (0, Hp - H))).reshape(I, 4 * Hp)
    wh_p = jnp.pad(wh, ((0, 0), (0, 0), (0, Hp - H)))            # (H, 4, Hp)
    wh_p = jnp.pad(wh_p, ((0, Hp - H), (0, 0), (0, 0))).reshape(Hp, 4 * Hp)
    b_p = jnp.pad(b, ((0, 0), (0, Hp - H))).reshape(1, 4 * Hp)

    return dict(
        I=I, H=H, Hp=Hp,
        w_x=wx_p.astype(weight_dtype),   # (I, 4Hp)
        w_h=wh_p.astype(weight_dtype),   # (Hp, 4Hp)
        bias=b_p,                        # (1, 4Hp) f32
    )


# ---------------------------------------------------------------------------
# Single cell step (matches LSTMcell_tied.forward)
# ---------------------------------------------------------------------------
def lstm_cell_kernel(x_ref, h0_ref, c0_ref, wx_ref, wh_ref, b_ref,
                     h1_ref, c1_ref):
    Hp = c0_ref.shape[1]
    wdt = wx_ref.dtype
    gates = (jnp.dot(x_ref[...].astype(wdt), wx_ref[...],
                     preferred_element_type=jnp.float32)
             + jnp.dot(h0_ref[...].astype(wdt), wh_ref[...],
                       preferred_element_type=jnp.float32)
             + b_ref[...])

    gate_i = jax.nn.sigmoid(gates[:, 0 * Hp:1 * Hp])
    gate_f = jax.nn.sigmoid(gates[:, 1 * Hp:2 * Hp])
    gate_c = jnp.tanh(gates[:, 2 * Hp:3 * Hp])
    gate_o = jax.nn.sigmoid(gates[:, 3 * Hp:4 * Hp])

    c1 = gate_f * c0_ref[...] + gate_i * gate_c
    h1 = gate_o * jnp.tanh(c1)

    c1_ref[...] = c1.astype(c1_ref.dtype)
    h1_ref[...] = h1.astype(h1_ref.dtype)


def lstm_cell_tied_padded(x, h0p, c0p, params, bm_target=256):
    """One step on padded state.  x: (Bp, I); h0p/c0p: (Bp, Hp).  No host-side
    concat/pad/slice; suitable for calling repeatedly inside an outer scan."""
    Bp, I = x.shape
    Hp = params["Hp"]
    bm = bm_target if (bm_target <= Bp and Bp % bm_target == 0) else Bp
    nb = Bp // bm
    wsize = params["w_x"].dtype.itemsize

    est = ((I * 4 * Hp + Hp * 4 * Hp) * wsize * 2          # resident weights (x2 buf)
           + (bm * I + 2 * bm * Hp) * 4 * 2                # in blocks (x2 buf)
           + 4 * Hp * 4 * 2                                 # bias
           + 2 * bm * Hp * 4 * 2                            # out blocks (x2 buf)
           + 8 * bm * Hp * 4)                               # gate intermediates

    h1p, c1p = pl.pallas_call(
        lstm_cell_kernel,
        out_shape=(jax.ShapeDtypeStruct((Bp, Hp), jnp.float32),
                   jax.ShapeDtypeStruct((Bp, Hp), jnp.float32)),
        grid=(nb,),
        in_specs=[
            pl.BlockSpec((bm, I), lambda i: (i, 0)),
            pl.BlockSpec((bm, Hp), lambda i: (i, 0)),
            pl.BlockSpec((bm, Hp), lambda i: (i, 0)),
            pl.BlockSpec((I, 4 * Hp), lambda i: (0, 0)),       # w_x resident
            pl.BlockSpec((Hp, 4 * Hp), lambda i: (0, 0)),      # w_h resident
            pl.BlockSpec((1, 4 * Hp), lambda i: (0, 0)),       # bias f32
        ],
        out_specs=(pl.BlockSpec((bm, Hp), lambda i: (i, 0)),
                   pl.BlockSpec((bm, Hp), lambda i: (i, 0))),
        compiler_params=pltpu.CompilerParams(
            dimension_semantics=("parallel",),
            vmem_limit_bytes=_vmem_limit_bytes(est)),
    )(x, h0p, c0p, params["w_x"], params["w_h"], params["bias"])
    return h1p, c1p


def lstm_cell_tied(x, hidden, params, bm_target=256):
    """Module-matching step.  x: (B, I); hidden = (h0, c0) each (B, H)."""
    h0, c0 = hidden
    B = x.shape[0]
    H, Hp = params["H"], params["Hp"]

    if h0 is None:
        h0 = jnp.zeros((B, H), jnp.float32)
    if c0 is None:
        c0 = jnp.zeros((B, H), jnp.float32)

    bm, Bp = _pick_batch_block(B, bm_target)
    x_p = jnp.pad(x.astype(jnp.float32), ((0, Bp - B), (0, 0)))
    h0p = jnp.pad(h0.astype(jnp.float32), ((0, Bp - B), (0, Hp - H)))
    c0p = jnp.pad(c0.astype(jnp.float32), ((0, Bp - B), (0, Hp - H)))

    h1p, c1p = lstm_cell_tied_padded(x_p, h0p, c0p, params, bm_target=bm)
    return h1p[:B, :H], c1p[:B, :H]


# ---------------------------------------------------------------------------
# Sequence variant: fused input projection, TT time steps per grid iteration
# ---------------------------------------------------------------------------
def lstm_seq_kernel(xs_ref, wx_ref, wh_ref, b_ref, h0_ref, c0_ref,
                    hseq_ref, hN_ref, cN_ref, h_sc, c_sc):
    t = pl.program_id(1)
    Hp = h_sc.shape[1]
    TT = xs_ref.shape[0]
    wdt = wx_ref.dtype

    @pl.when(t == 0)
    def _init():
        h_sc[...] = h0_ref[...]
        c_sc[...] = c0_ref[...]

    bias = b_ref[...]  # (1, 4Hp) f32

    def step(s, carry):
        # Fused: input projection + recurrent dot, both against resident weights.
        gates = (jnp.dot(xs_ref[s].astype(wdt), wx_ref[...],
                         preferred_element_type=jnp.float32)
                 + jnp.dot(h_sc[...].astype(wdt), wh_ref[...],
                           preferred_element_type=jnp.float32)
                 + bias)

        gate_i = jax.nn.sigmoid(gates[:, 0 * Hp:1 * Hp])
        gate_f = jax.nn.sigmoid(gates[:, 1 * Hp:2 * Hp])
        gate_c = jnp.tanh(gates[:, 2 * Hp:3 * Hp])
        gate_o = jax.nn.sigmoid(gates[:, 3 * Hp:4 * Hp])

        c1 = gate_f * c_sc[...] + gate_i * gate_c
        h1 = gate_o * jnp.tanh(c1)

        c_sc[...] = c1
        h_sc[...] = h1
        hseq_ref[s] = h1.astype(hseq_ref.dtype)
        return carry

    jax.lax.fori_loop(0, TT, step, 0, unroll=True)

    @pl.when(t == pl.num_programs(1) - 1)
    def _finalize():
        hN_ref[...] = h_sc[...].astype(hN_ref.dtype)
        cN_ref[...] = c_sc[...].astype(cN_ref.dtype)


def lstm_cell_tied_sequence(xs, h0, c0, params, bm_target=256, tt_target=8):
    """Apply the cell over xs: (T, B, I).  Returns (h_seq, (hT, cT))."""
    T, B, I = xs.shape
    H, Hp = params["H"], params["Hp"]

    bm, Bp = _pick_batch_block(B, bm_target)
    nb = Bp // bm
    TT = _pick_time_block(T, tt_target)
    nt = T // TT

    xs_p = xs.astype(jnp.float32)
    if Bp != B:
        xs_p = jnp.pad(xs_p, ((0, 0), (0, Bp - B), (0, 0)))
    if h0 is None:
        h0 = jnp.zeros((B, H), jnp.float32)
    if c0 is None:
        c0 = jnp.zeros((B, H), jnp.float32)
    h0p = jnp.pad(h0.astype(jnp.float32), ((0, Bp - B), (0, Hp - H)))
    c0p = jnp.pad(c0.astype(jnp.float32), ((0, Bp - B), (0, Hp - H)))

    wsize = params["w_x"].dtype.itemsize
    est = ((I * 4 * Hp + Hp * 4 * Hp) * wsize * 2           # resident weights (x2 buf)
           + (TT * bm * I + 2 * bm * Hp) * 4 * 2            # xs + h0/c0 blocks
           + 4 * Hp * 4 * 2                                  # bias
           + (TT * bm * Hp + 2 * bm * Hp) * 4 * 2            # out blocks (x2 buf)
           + 2 * bm * Hp * 4                                  # h/c scratch
           + 8 * bm * Hp * 4)                                 # gate intermediates

    h_seq, hN, cN = pl.pallas_call(
        lstm_seq_kernel,
        out_shape=(jax.ShapeDtypeStruct((T, Bp, Hp), jnp.float32),
                   jax.ShapeDtypeStruct((Bp, Hp), jnp.float32),
                   jax.ShapeDtypeStruct((Bp, Hp), jnp.float32)),
        grid=(nb, nt),
        in_specs=[
            pl.BlockSpec((TT, bm, I), lambda b, t: (t, b, 0)),   # raw inputs
            pl.BlockSpec((I, 4 * Hp), lambda b, t: (0, 0)),      # w_x resident
            pl.BlockSpec((Hp, 4 * Hp), lambda b, t: (0, 0)),     # w_h resident
            pl.BlockSpec((1, 4 * Hp), lambda b, t: (0, 0)),      # bias f32
            pl.BlockSpec((bm, Hp), lambda b, t: (b, 0)),
            pl.BlockSpec((bm, Hp), lambda b, t: (b, 0)),
        ],
        out_specs=(pl.BlockSpec((TT, bm, Hp), lambda b, t: (t, b, 0)),
                   pl.BlockSpec((bm, Hp), lambda b, t: (b, 0)),
                   pl.BlockSpec((bm, Hp), lambda b, t: (b, 0))),
        scratch_shapes=[pltpu.VMEM((bm, Hp), jnp.float32),
                        pltpu.VMEM((bm, Hp), jnp.float32)],
        compiler_params=pltpu.CompilerParams(
            dimension_semantics=("parallel", "arbitrary"),
            vmem_limit_bytes=_vmem_limit_bytes(est)),
    )(xs_p, params["w_x"], params["w_h"], params["bias"], h0p, c0p)

    return h_seq[:, :B, :H], (hN[:B, :H], cN[:B, :H])


# ---------------------------------------------------------------------------
# Pure-JAX reference
# ---------------------------------------------------------------------------
def lstm_cell_reference(x, h0, c0, w_ih, w_hh, b_ih, b_hh):
    hi = jax.lax.Precision.HIGHEST
    gates = (jnp.dot(x, w_ih.T, precision=hi) + b_ih
             + jnp.dot(h0, w_hh.T, precision=hi) + b_hh)
    H = w_hh.shape[1]
    gi = jax.nn.sigmoid(gates[:, 0:H])
    gf = jax.nn.sigmoid(gates[:, H:2 * H])
    gc = jnp.tanh(gates[:, 2 * H:3 * H])
    go = jax.nn.sigmoid(gates[:, 3 * H:4 * H])
    c1 = gf * c0 + gi * gc
    h1 = go * jnp.tanh(c1)
    return h1, c1


if __name__ == "__main__":
    inputSize, hiddenSize, batch, seqLen = 16, 32, 8, 8

    key = jax.random.PRNGKey(0)
    ks = jax.random.split(key, 8)

    # reset_parameters(): uniform(-stdv, stdv), stdv = 1/sqrt(hiddenSize)
    stdv = 1.0 / math.sqrt(hiddenSize)
    w_ih = jax.random.uniform(ks[0], (4 * hiddenSize, inputSize),
                              jnp.float32, -stdv, stdv)
    w_hh = jax.random.uniform(ks[1], (4 * hiddenSize, hiddenSize),
                              jnp.float32, -stdv, stdv)
    b_ih = jax.random.uniform(ks[2], (4 * hiddenSize,), jnp.float32, -stdv, stdv)
    b_hh = jax.random.uniform(ks[3], (4 * hiddenSize,), jnp.float32, -stdv, stdv)

    x = jax.random.normal(ks[4], (batch, inputSize), jnp.float32)
    h0 = jax.random.normal(ks[5], (batch, hiddenSize), jnp.float32)
    c0 = jax.random.normal(ks[6], (batch, hiddenSize), jnp.float32)
    xs = jax.random.normal(ks[7], (seqLen, batch, inputSize), jnp.float32)

    # One-time parameter preprocessing (hoisted out of step calls).
    params_f32 = prepare_lstm_params(w_ih, w_hh, b_ih, b_hh,
                                     weight_dtype=jnp.float32)
    params_bf16 = prepare_lstm_params(w_ih, w_hh, b_ih, b_hh)  # bf16 default

    h1_ref, c1_ref = lstm_cell_reference(x, h0, c0, w_ih, w_hh, b_ih, b_hh)

    # --- single cell step, f32 weights (tight tolerance) ---
    h1, c1 = lstm_cell_tied(x, (h0, c0), params_f32)
    jax.block_until_ready((h1, c1))
    assert jnp.allclose(h1, h1_ref, atol=1e-4, rtol=1e-4)
    assert jnp.allclose(c1, c1_ref, atol=1e-4, rtol=1e-4)

    # --- single cell step, bf16 weights (MXU-native; looser tolerance) ---
    h1b, c1b = lstm_cell_tied(x, (h0, c0), params_bf16)
    jax.block_until_ready((h1b, c1b))
    assert jnp.allclose(h1b, h1_ref, atol=2e-2, rtol=2e-2)
    assert jnp.allclose(c1b, c1_ref, atol=2e-2, rtol=2e-2)

    # --- sequence variant (fused input projection, in-kernel time loop) ---
    h_seq, (hN, cN) = lstm_cell_tied_sequence(xs, h0, c0, params_bf16)
    jax.block_until_ready((h_seq, hN, cN))
    h_r, c_r = h0, c0
    hs_ref = []
    for t in range(seqLen):
        h_r, c_r = lstm_cell_reference(xs[t], h_r, c_r, w_ih, w_hh, b_ih, b_hh)
        hs_ref.append(h_r)
    hs_ref = jnp.stack(hs_ref, axis=0)
    assert jnp.allclose(h_seq, hs_ref, atol=2e-2, rtol=2e-2)
    assert jnp.allclose(hN, h_r, atol=2e-2, rtol=2e-2)
    assert jnp.allclose(cN, c_r, atol=2e-2, rtol=2e-2)

    print("KERNEL_OK")
</pallas_src>

<mosaic_0001>
module attributes {stable_mosaic.version = 11 : i64} {
  func.func @lstm_cell_kernel(%arg0: i32, %arg1: memref<8x16xf32, #tpu.memory_space<vmem>>, %arg2: memref<8x128xf32, #tpu.memory_space<vmem>>, %arg3: memref<8x128xf32, #tpu.memory_space<vmem>>, %arg4: memref<16x512xf32, #tpu.memory_space<vmem>>, %arg5: memref<128x512xf32, #tpu.memory_space<vmem>>, %arg6: memref<1x512xf32, #tpu.memory_space<vmem>>, %arg7: memref<8x128xf32, #tpu.memory_space<vmem>>, %arg8: memref<8x128xf32, #tpu.memory_space<vmem>>) attributes {dimension_semantics = [#tpu.dimension_semantics<parallel>], iteration_bounds = array<i64: 1>, scalar_prefetch = 0 : i64, scratch_operands = 0 : i64, tpu.core_type = #tpu.core_type<tc>, window_params = [{transform_indices = @transform_0, window_bounds = array<i64: 8, 16>}, {transform_indices = @transform_1, window_bounds = array<i64: 8, 128>}, {transform_indices = @transform_2, window_bounds = array<i64: 8, 128>}, {pipeline_mode = #tpu.pipeline_mode<synchronous>, transform_indices = @transform_3, window_bounds = array<i64: 16, 512>}, {pipeline_mode = #tpu.pipeline_mode<synchronous>, transform_indices = @transform_4, window_bounds = array<i64: 128, 512>}, {pipeline_mode = #tpu.pipeline_mode<synchronous>, transform_indices = @transform_5, window_bounds = array<i64: 1, 512>}, {transform_indices = @transform_6, window_bounds = array<i64: 8, 128>}, {transform_indices = @transform_7, window_bounds = array<i64: 8, 128>}]} {
    %c0 = arith.constant 0 : index
    %c0_0 = arith.constant 0 : index
    %0 = vector.load %arg1[%c0, %c0_0] : memref<8x16xf32, #tpu.memory_space<vmem>>, vector<8x16xf32>
    %c0_1 = arith.constant 0 : index
    %c0_2 = arith.constant 0 : index
    %1 = vector.load %arg4[%c0_1, %c0_2] : memref<16x512xf32, #tpu.memory_space<vmem>>, vector<16x512xf32>
    %cst = arith.constant dense<0.000000e+00> : vector<8x512xf32>
    %2 = tpu.matmul %0, %1, %cst {dimension_numbers = #tpu.dot_dimension_numbers<[1], [0], [0], [1], [0, 0, 1, 1], [], []>} : vector<8x16xf32>, vector<16x512xf32>, vector<8x512xf32> -> vector<8x512xf32>
    %c0_3 = arith.constant 0 : index
    %c0_4 = arith.constant 0 : index
    %3 = vector.load %arg2[%c0_3, %c0_4] : memref<8x128xf32, #tpu.memory_space<vmem>>, vector<8x128xf32>
    %c0_5 = arith.constant 0 : index
    %c0_6 = arith.constant 0 : index
    %4 = vector.load %arg5[%c0_5, %c0_6] : memref<128x512xf32, #tpu.memory_space<vmem>>, vector<128x512xf32>
    %cst_7 = arith.constant dense<0.000000e+00> : vector<8x512xf32>
    %5 = tpu.matmul %3, %4, %cst_7 {dimension_numbers = #tpu.dot_dimension_numbers<[1], [0], [0], [1], [0, 0, 1, 1], [], []>} : vector<8x128xf32>, vector<128x512xf32>, vector<8x512xf32> -> vector<8x512xf32>
    %6 = arith.addf %2, %5 : vector<8x512xf32>
    %c0_8 = arith.constant 0 : index
    %c0_9 = arith.constant 0 : index
    %7 = vector.load %arg6[%c0_8, %c0_9] : memref<1x512xf32, #tpu.memory_space<vmem>>, vector<1x512xf32>
    %8 = vector.broadcast %7 : vector<1x512xf32> to vector<8x512xf32>
    %9 = arith.addf %6, %8 : vector<8x512xf32>
    %10 = vector.extract_strided_slice %9 {offsets = [0, 0], sizes = [8, 128], strides = [1, 1]} : vector<8x512xf32> to vector<8x128xf32>
    %11 = arith.negf %10 : vector<8x128xf32>
    %12 = math.exp %11 : vector<8x128xf32>
    %cst_10 = arith.constant 1.000000e+00 : f32
    %13 = vector.broadcast %cst_10 : f32 to vector<8x128xf32>
    %14 = arith.addf %13, %12 : vector<8x128xf32>
    %15 = arith.divf %13, %14 : vector<8x128xf32>
    %16 = vector.extract_strided_slice %9 {offsets = [0, 128], sizes = [8, 128], strides = [1, 1]} : vector<8x512xf32> to vector<8x128xf32>
    %17 = arith.negf %16 : vector<8x128xf32>
    %18 = math.exp %17 : vector<8x128xf32>
    %cst_11 = arith.constant 1.000000e+00 : f32
    %19 = vector.broadcast %cst_11 : f32 to vector<8x128xf32>
    %20 = arith.addf %19, %18 : vector<8x128xf32>
    %21 = arith.divf %19, %20 : vector<8x128xf32>
    %22 = vector.extract_strided_slice %9 {offsets = [0, 256], sizes = [8, 128], strides = [1, 1]} : vector<8x512xf32> to vector<8x128xf32>
    %23 = math.tanh %22 : vector<8x128xf32>
    %24 = vector.extract_strided_slice %9 {offsets = [0, 384], sizes = [8, 128], strides = [1, 1]} : vector<8x512xf32> to vector<8x128xf32>
    %25 = arith.negf %24 : vector<8x128xf32>
    %26 = math.exp %25 : vector<8x128xf32>
    %cst_12 = arith.constant 1.000000e+00 : f32
    %27 = vector.broadcast %cst_12 : f32 to vector<8x128xf32>
    %28 = arith.addf %27, %26 : vector<8x128xf32>
    %29 = arith.divf %27, %28 : vector<8x128xf32>
    %c0_13 = arith.constant 0 : index
    %c0_14 = arith.constant 0 : index
    %30 = vector.load %arg3[%c0_13, %c0_14] : memref<8x128xf32, #tpu.memory_space<vmem>>, vector<8x128xf32>
    %31 = arith.mulf %21, %30 : vector<8x128xf32>
    %32 = arith.mulf %15, %23 : vector<8x128xf32>
    %33 = arith.addf %31, %32 : vector<8x128xf32>
    %34 = math.tanh %33 : vector<8x128xf32>
    %35 = arith.mulf %29, %34 : vector<8x128xf32>
    %c0_15 = arith.constant 0 : index
    %c0_16 = arith.constant 0 : index
    %36 = vector.load %arg8[%c0_15, %c0_16] : memref<8x128xf32, #tpu.memory_space<vmem>>, vector<8x128xf32>
    tpu.vector_store %arg8[%c0_15, %c0_16], %33 {strides = array<i32>} : memref<8x128xf32, #tpu.memory_space<vmem>>, vector<8x128xf32>,
    %c0_17 = arith.constant 0 : index
    %c0_18 = arith.constant 0 : index
    %37 = vector.load %arg7[%c0_17, %c0_18] : memref<8x128xf32, #tpu.memory_space<vmem>>, vector<8x128xf32>
    tpu.vector_store %arg7[%c0_17, %c0_18], %35 {strides = array<i32>} : memref<8x128xf32, #tpu.memory_space<vmem>>, vector<8x128xf32>,
    return
  }
  func.func @transform_0(%arg0: i32) -> (i32, i32) {
    %c0_i32 = arith.constant 0 : i32
    %c0_i32_0 = arith.constant 0 : i32
    return %arg0, %c0_i32 : i32, i32
  }
  func.func @transform_1(%arg0: i32) -> (i32, i32) {
    %c0_i32 = arith.constant 0 : i32
    %c0_i32_0 = arith.constant 0 : i32
    return %arg0, %c0_i32 : i32, i32
  }
  func.func @transform_2(%arg0: i32) -> (i32, i32) {
    %c0_i32 = arith.constant 0 : i32
    %c0_i32_0 = arith.constant 0 : i32
    return %arg0, %c0_i32 : i32, i32
  }
  func.func @transform_3(%arg0: i32) -> (i32, i32) {
    %c0_i32 = arith.constant 0 : i32
    %c0_i32_0 = arith.constant 0 : i32
    %c0_i32_1 = arith.constant 0 : i32
    return %c0_i32, %c0_i32_0 : i32, i32
  }
  func.func @transform_4(%arg0: i32) -> (i32, i32) {
    %c0_i32 = arith.constant 0 : i32
    %c0_i32_0 = arith.constant 0 : i32
    %c0_i32_1 = arith.constant 0 : i32
    return %c0_i32, %c0_i32_0 : i32, i32
  }
  func.func @transform_5(%arg0: i32) -> (i32, i32) {
    %c0_i32 = arith.constant 0 : i32
    %c0_i32_0 = arith.constant 0 : i32
    %c0_i32_1 = arith.constant 0 : i32
    return %c0_i32, %c0_i32_0 : i32, i32
  }
  func.func @transform_6(%arg0: i32) -> (i32, i32) {
    %c0_i32 = arith.constant 0 : i32
    %c0_i32_0 = arith.constant 0 : i32
    return %arg0, %c0_i32 : i32, i32
  }
  func.func @transform_7(%arg0: i32) -> (i32, i32) {
    %c0_i32 = arith.constant 0 : i32
    %c0_i32_0 = arith.constant 0 : i32
    return %arg0, %c0_i32 : i32, i32
  }
}

</mosaic_0001>

<bundles_post_ra>
// kernel: tpu_custom_call.1
= control target key start
LH: loop header
LB: loop body
LE: loop exit
PB: predicated region body
PF: predicated region fallthrough
CT: control target
= control target key end

     0   :  { %13 = vsyncpa [#allocation3], 0  ;;  %s735_s0 = inlined_call_operand.hbm [shape: f32[8,16], index: 0, kind: input, shape index: {}]   ;;  %s736_s1 = inlined_call_operand.hbm [shape: f32[8,128], index: 1, kind: input, shape index: {}]   ;;  %s737_s2 = inlined_call_operand.hbm [shape: f32[8,128], index: 2, kind: input, shape index: {}]   ;;  %s738_s3 = inlined_call_operand.hbm [shape: f32[16,512], index: 3, kind: input, shape index: {}]   ;;  %s739_s4 = inlined_call_operand.hbm [shape: f32[128,512], index: 4, kind: input, shape index: {}]   ;;  %s740_s5 = inlined_call_operand.vmem [shape: f32[1,512], index: 5, kind: input, shape index: {}]   ;;  %s741_s6 = inlined_call_operand.hbm [shape: f32[8,128], index: 6, kind: output, shape index: {0}]   ;;  %s742_s7 = inlined_call_operand.hbm [shape: f32[8,128], index: 7, kind: output, shape index: {1}]  }
   0x1   :  { %14 = vsyncpa [#allocation6], 0 }
   0x2   :  { %15 = vsyncpa [#allocation9], 0 }
   0x3   :  { %16 = vsyncpa [#allocation4], 0  ;;  %s34_s26 = sshll.u32 %s736_s1, 4  ;;  %s35_s26 = int_to_ptr.hbm [resolvable:$true] %s34_s26 }
   0x4   :  { %17 = vsyncpa [#allocation13], 0  ;;  %s662_s27 = smov [#allocation5]   ;;  %s55_s8 = sshll.u32 %s738_s3, 4  ;;  %s56_s8 = int_to_ptr.hbm [resolvable:$true] %s55_s8 }
   0x5   :  { %s36_s28 = sshll.u32 %s662_s27, 4  ;;  %s663_s9 = smov [#allocation8]   ;;  %s37_s28 = int_to_ptr.vmem [resolvable:$true] %s36_s28 }
   0x6   :  { %39 = dma.hbm_to_vmem [thread:$0]  %s35_s26, 128, %s37_s28, [#allocation6]  }
   0x7   :  { %s57_s10 = sshll.u32 %s663_s9, 4  ;;  %s664_s11 = smov 512   ;;  %s58_s10 = int_to_ptr.vmem [resolvable:$true] %s57_s10 }
   0x8   :  { %s665_s12 = smov 32   ;;  %s23_s1 = sshll.u32 %s735_s0, 4  ;;  %s24_s1 = int_to_ptr.hbm [resolvable:$true] %s23_s1 }
   0x9   :  { %63 = dma.hbm_to_vmem [thread:$0]  %s56_s8, 1024, %s58_s10, [#allocation9], %s664_s11, %s664_s11, %s665_s12  }
   0xa   :  { %s666_s15 = smov [#allocation2]   ;;  %s45_s3 = sshll.u32 %s737_s2, 4  ;;  %s46_s3 = int_to_ptr.hbm [resolvable:$true] %s45_s3 }
   0xb   :  { %s25_s16 = sshll.u32 %s666_s15, 4  ;;  %s667_s19 = smov [#allocation7]   ;;  %s26_s16 = int_to_ptr.vmem [resolvable:$true] %s25_s16 }
   0xc   :  { %28 = dma.hbm_to_vmem [thread:$0]  %s24_s1, 128, %s26_s16, [#allocation3]  }
   0xd   :  { %s47_s20 = sshll.u32 %s667_s19, 4  ;;  %s68_s23 = sshll.u32 %s739_s4, 4  ;;  %s48_s20 = int_to_ptr.vmem [resolvable:$true] %s47_s20  ;;  %s69_s23 = int_to_ptr.hbm [resolvable:$true] %s68_s23 }
   0xe   :  { %50 = dma.hbm_to_vmem [thread:$0]  %s46_s3, 128, %s48_s20, [#allocation6]  }
   0xf   :  { %s668_s0 = smov [#allocation10]  }
  0x10   :  { %s70_s24 = sshll.u32 %s668_s0, 4  ;;  %s71_s24 = int_to_ptr.vmem [resolvable:$true] %s70_s24 }
  0x11   :  { %76 = dma.hbm_to_vmem [thread:$0]  %s69_s23, 8192, %s71_s24, [#allocation9], %s664_s11, %s664_s11, %s665_s12  }
  0x12   :  { %652 = dma.done.wait [#allocation3], 128  }
  0x13   :  { %653 = vsyncadd [#allocation3], 4294967168 }
  0x14   :  { %654 = dma.done.wait [#allocation6], 256  }
  0x15   :  { %655 = vsyncadd [#allocation6], 4294967040 }
  0x16   :  { %656 = dma.done.wait [#allocation9], 9216  }
  0x17   :  { %657 = vsyncadd [#allocation9], 4294958080  ;;  %v169_v0 = vld [vmem:[#allocation10 + $0x1e0] sm:$0xff]  ;;  %v170_v1 = vld [vmem:[#allocation10 + $0x1e8] sm:$0xff]  ;;  %vm253_vm0 = vcmask 130048   ;;  %s435_s28 = sshll.u32 %s742_s7, 4  ;;  %s436_s28 = int_to_ptr.hbm [resolvable:$true] %s435_s28 }
  0x18   :  { %v172_v2 = vld [vmem:[#allocation10 + $0x1f8] sm:$0xff]  ;;  %173 = vmatpush.msra.mxu0 %v169_v0  ;;  %193 = vmatpush.msra.mxu1 %v170_v1  ;;  %v165_v3 = vld [vmem:[#allocation10 + $0x1c0] sm:$0xff]  ;;  %v166_v4 = vld [vmem:[#allocation10 + $0x1c8] sm:$0xff]  ;;  %s670_s29 = smov [#allocation11]   ;;  %s424_s9 = sshll.u32 %s741_s6, 4  ;;  %s425_s9 = int_to_ptr.hbm [resolvable:$true] %s424_s9 }
  0x19   :  { %v168_v5 = vld [vmem:[#allocation10 + $0x1d8] sm:$0xff]  ;;  %233 = vmatpush.msra.mxu3 %v172_v2  ;;  %v161_v6 = vld [vmem:[#allocation10 + $0x1a0] sm:$0xff]  ;;  %v162_v7 = vld [vmem:[#allocation10 + $0x1a8] sm:$0xff]  ;;  %s422_s30 = sshll.u32 %s670_s29, 4  ;;  %s423_s30 = int_to_ptr.vmem [resolvable:$true] %s422_s30 }
  0x1a   :  { %174 = vmatpush.msra.mxu0 %v165_v3  ;;  %194 = vmatpush.msra.mxu1 %v166_v4  ;;  %v164_v8 = vld [vmem:[#allocation10 + $0x1b8] sm:$0xff]  ;;  %v157_v9 = vld [vmem:[#allocation10 + $0x180] sm:$0xff]  ;;  %v158_v10 = vld [vmem:[#allocation10 + $0x188] sm:$0xff] }
  0x1b   :  { %234 = vmatpush.msra.mxu3 %v168_v5  ;;  %v171_v11 = vld [vmem:[#allocation10 + $0x1f0] sm:$0xff]  ;;  %v160_v12 = vld [vmem:[#allocation10 + $0x198] sm:$0xff]  ;;  %v153_v14 = vld [vmem:[#allocation10 + $0x160] sm:$0xff] }
  0x1c   :  { %175 = vmatpush.msra.mxu0 %v161_v6  ;;  %195 = vmatpush.msra.mxu1 %v162_v7  ;;  %v167_v13 = vld [vmem:[#allocation10 + $0x1d0] sm:$0xff]  ;;  %v154_v15 = vld [vmem:[#allocation10 + $0x168] sm:$0xff]  ;;  %v156_v16 = vld [vmem:[#allocation10 + $0x178] sm:$0xff] }
  0x1d   :  { %235 = vmatpush.msra.mxu3 %v164_v8  ;;  %213 = vmatpush.msra.mxu2 %v171_v11  ;;  %v163_v17 = vld [vmem:[#allocation10 + $0x1b0] sm:$0xff]  ;;  %v149_v18 = vld [vmem:[#allocation10 + $0x140] sm:$0xff]  ;;  %v150_v19 = vld [vmem:[#allocation10 + $0x148] sm:$0xff] }
  0x1e   :  { %176 = vmatpush.msra.mxu0 %v157_v9  ;;  %196 = vmatpush.msra.mxu1 %v158_v10  ;;  %v152_v20 = vld [vmem:[#allocation10 + $0x158] sm:$0xff]  ;;  %v159_v21 = vld [vmem:[#allocation10 + $0x190] sm:$0xff]  ;;  %v145_v22 = vld [vmem:[#allocation10 + $0x120] sm:$0xff] }
  0x1f   :  { %236 = vmatpush.msra.mxu3 %v160_v12  ;;  %214 = vmatpush.msra.mxu2 %v167_v13  ;;  %v146_v23 = vld [vmem:[#allocation10 + $0x128] sm:$0xff]  ;;  %v148_v24 = vld [vmem:[#allocation10 + $0x138] sm:$0xff]  ;;  %v155_v25 = vld [vmem:[#allocation10 + $0x170] sm:$0xff] }
  0x20   :  { %177 = vmatpush.msra.mxu0 %v153_v14  ;;  %197 = vmatpush.msra.mxu1 %v154_v15  ;;  %v141_v26 = vld [vmem:[#allocation10 + $0x100] sm:$0xff]  ;;  %v142_v27 = vld [vmem:[#allocation10 + $0x108] sm:$0xff]  ;;  %v144_v28 = vld [vmem:[#allocation10 + $0x118] sm:$0xff] }
  0x21   :  { %237 = vmatpush.msra.mxu3 %v156_v16  ;;  %215 = vmatpush.msra.mxu2 %v163_v17  ;;  %v151_v29 = vld [vmem:[#allocation10 + $0x150] sm:$0xff]  ;;  %v137_v30 = vld [vmem:[#allocation10 + $0xe0] sm:$0xff]  ;;  %v138_v31 = vld [vmem:[#allocation10 + $0xe8] sm:$0xff] }
  0x22   :  { %178 = vmatpush.msra.mxu0 %v149_v18  ;;  %198 = vmatpush.msra.mxu1 %v150_v19  ;;  %v140_v32 = vld [vmem:[#allocation10 + $0xf8] sm:$0xff]  ;;  %v147_v33 = vld [vmem:[#allocation10 + $0x130] sm:$0xff]  ;;  %v133_v34 = vld [vmem:[#allocation10 + $0xc0] sm:$0xff] }
  0x23   :  { %238 = vmatpush.msra.mxu3 %v152_v20  ;;  %216 = vmatpush.msra.mxu2 %v159_v21  ;;  %v134_v35 = vld [vmem:[#allocation10 + $0xc8] sm:$0xff]  ;;  %v136_v36 = vld [vmem:[#allocation10 + $0xd8] sm:$0xff]  ;;  %v143_v37 = vld [vmem:[#allocation10 + $0x110] sm:$0xff] }
  0x24   :  { %179 = vmatpush.msra.mxu0 %v145_v22  ;;  %199 = vmatpush.msra.mxu1 %v146_v23  ;;  %v129_v38 = vld [vmem:[#allocation10 + $0xa0] sm:$0xff]  ;;  %v130_v39 = vld [vmem:[#allocation10 + $0xa8] sm:$0xff]  ;;  %v132_v40 = vld [vmem:[#allocation10 + $0xb8] sm:$0xff] }
  0x25   :  { %239 = vmatpush.msra.mxu3 %v148_v24  ;;  %217 = vmatpush.msra.mxu2 %v155_v25  ;;  %v139_v41 = vld [vmem:[#allocation10 + $0xf0] sm:$0xff]  ;;  %v125_v42 = vld [vmem:[#allocation10 + $0x80] sm:$0xff]  ;;  %v126_v43 = vld [vmem:[#allocation10 + $0x88] sm:$0xff] }
  0x26   :  { %180 = vmatpush.msra.mxu0 %v141_v26  ;;  %200 = vmatpush.msra.mxu1 %v142_v27  ;;  %v128_v44 = vld [vmem:[#allocation10 + $0x98] sm:$0xff]  ;;  %v135_v45 = vld [vmem:[#allocation10 + $0xd0] sm:$0xff]  ;;  %v121_v46 = vld [vmem:[#allocation10 + $0x60] sm:$0xff] }
  0x27   :  { %240 = vmatpush.msra.mxu3 %v144_v28  ;;  %218 = vmatpush.msra.mxu2 %v151_v29  ;;  %v122_v47 = vld [vmem:[#allocation10 + $0x68] sm:$0xff]  ;;  %v124_v48 = vld [vmem:[#allocation10 + $0x78] sm:$0xff]  ;;  %v131_v49 = vld [vmem:[#allocation10 + $0xb0] sm:$0xff] }
  0x28   :  { %181 = vmatpush.msra.mxu0 %v137_v30  ;;  %201 = vmatpush.msra.mxu1 %v138_v31  ;;  %v117_v50 = vld [vmem:[#allocation10 + $0x40] sm:$0xff]  ;;  %v118_v51 = vld [vmem:[#allocation10 + $0x48] sm:$0xff]  ;;  %v120_v52 = vld [vmem:[#allocation10 + $0x58] sm:$0xff] }
  0x29   :  { %241 = vmatpush.msra.mxu3 %v140_v32  ;;  %219 = vmatpush.msra.mxu2 %v147_v33  ;;  %v127_v53 = vld [vmem:[#allocation10 + $0x90] sm:$0xff]  ;;  %v113_v54 = vld [vmem:[#allocation10 + $0x20] sm:$0xff]  ;;  %v114_v55 = vld [vmem:[#allocation10 + $0x28] sm:$0xff] }
  0x2a   :  { %182 = vmatpush.msra.mxu0 %v133_v34  ;;  %202 = vmatpush.msra.mxu1 %v134_v35  ;;  %v116_v56 = vld [vmem:[#allocation10 + $0x38] sm:$0xff]  ;;  %v123_v57 = vld [vmem:[#allocation10 + $0x70] sm:$0xff]  ;;  %v109_v58 = vld [vmem:[#allocation10] sm:$0xff] }
  0x2b   :  { %242 = vmatpush.msra.mxu3 %v136_v36  ;;  %220 = vmatpush.msra.mxu2 %v143_v37  ;;  %v110_v59 = vld [vmem:[#allocation10 + $0x8] sm:$0xff]  ;;  %v112_v60 = vld [vmem:[#allocation10 + $0x18] sm:$0xff]  ;;  %v108_v61 = vld [vmem:[#allocation5] sm:$0xff] }
  0x2c   :  { %183 = vmatpush.msra.mxu0 %v129_v38  ;;  %203 = vmatpush.msra.mxu1 %v130_v39  ;;  %v104_v62 = vld [vmem:[#allocation8 + $0x20] sm:$0xff]  ;;  %v105_v63 = vld [vmem:[#allocation8 + $0x28] sm:$0xff]  ;;  %v119_v0 = vld [vmem:[#allocation10 + $0x50] sm:$0xff] }
  0x2d   :  { %243 = vmatpush.msra.mxu3 %v132_v40  ;;  %221 = vmatpush.msra.mxu2 %v139_v41  ;;  %v107_v1 = vld [vmem:[#allocation8 + $0x38] sm:$0xff]  ;;  %v100_v2 = vld [vmem:[#allocation8] sm:$0xff]  ;;  %v101_v3 = vld [vmem:[#allocation8 + $0x8] sm:$0xff] }
  0x2e   :  { %184 = vmatpush.msra.mxu0 %v125_v42  ;;  %204 = vmatpush.msra.mxu1 %v126_v43  ;;  %v115_v4 = vld [vmem:[#allocation10 + $0x30] sm:$0xff]  ;;  %v103_v5 = vld [vmem:[#allocation8 + $0x18] sm:$0xff]  ;;  %v99_v7 = vld [vmem:[#allocation2] sm:$0xff] }
  0x2f   :  { %244 = vmatpush.msra.mxu3 %v128_v44  ;;  %222 = vmatpush.msra.mxu2 %v135_v45  ;;  %v111_v6 = vld [vmem:[#allocation10 + $0x10] sm:$0xff]  ;;  %v337_v12 = vld [vmem:[%s740_s5] sm:$0xf]  ;;  %s669_s5 = smov [#allocation12]  }
  0x30   :  { %185 = vmatpush.msra.mxu0 %v121_v46  ;;  %205 = vmatpush.msra.mxu1 %v122_v47  ;;  %v106_v8 = vld [vmem:[#allocation8 + $0x30] sm:$0xff]  ;;  %v339_v14 = vperm.slane %v337_v12, 0  ;;  %v340_v16 = vperm.slane %v337_v12, 1  ;;  %v342_v25 = vperm.slane %v337_v12, 3  ;;  %v341_v36 = vperm.slane %v337_v12, 2  ;;  %s433_s25 = sshll.u32 %s669_s5, 4  ;;  %s434_s25 = int_to_ptr.vmem [resolvable:$true] %s433_s25 }
  0x31   :  { %245 = vmatpush.msra.mxu3 %v124_v48  ;;  %223 = vmatpush.msra.mxu2 %v131_v49  ;;  %v102_v9 = vld [vmem:[#allocation8 + $0x10] sm:$0xff] }
  0x32   :  { %186 = vmatpush.msra.mxu0 %v117_v50  ;;  %206 = vmatpush.msra.mxu1 %v118_v51 }
  0x33   :  { %246 = vmatpush.msra.mxu3 %v120_v52  ;;  %224 = vmatpush.msra.mxu2 %v127_v53 }
  0x34   :  { %187 = vmatpush.msra.mxu0 %v113_v54  ;;  %207 = vmatpush.msra.mxu1 %v114_v55 }
  0x35   :  { %247 = vmatpush.msra.mxu3 %v116_v56  ;;  %225 = vmatpush.msra.mxu2 %v123_v57 }
  0x36   :  { %188 = vmatpush.msra.mxu0 %v109_v58  ;;  %208 = vmatpush.msra.mxu1 %v110_v59  ;;  %v409_v59 = vld [vmem:[#allocation7] sm:$0xff] }
  0x37   :  { %248 = vmatpush.msra.mxu3 %v112_v60  ;;  %189 = vmatmul.f32.vlgmr.msra.gmra.mxu0 %v108_v61 }
  0x38   :  { %209 = vmatmul.f32.vlgmr.msra.gmra.mxu1 %v108_v61  ;;  %249 = vmatmul.f32.vlgmr.msra.gmra.mxu3 %v108_v61 }
  0x39   :  { %271 = vmatpush.msrb.mxu0 %v104_v62  ;;  %291 = vmatpush.msrb.mxu1 %v105_v63 }
  0x3a   :  { %226 = vmatpush.msra.mxu2 %v119_v0  ;;  %331 = vmatpush.msrb.mxu3 %v107_v1 }
  0x3b   :  { %272 = vmatpush.msrb.mxu0 %v100_v2  ;;  %292 = vmatpush.msrb.mxu1 %v101_v3 }
  0x3c   :  { %227 = vmatpush.msra.mxu2 %v115_v4  ;;  %332 = vmatpush.msrb.mxu3 %v103_v5 }
  0x3e   :  { %228 = vmatpush.msra.mxu2 %v111_v6 }
  0x3f   :  { %229 = vmatmul.f32.vlgmr.msra.gmra.mxu2 %v108_v61  ;;  %452 = vmatmul.msk.f32.vlgmr.msrb.gmra.mxu0 %vm253_vm0, %v99_v7 }
  0x40   :  { %453 = vmatmul.msk.f32.vlgmr.msrb.gmra.mxu1 %vm253_vm0, %v99_v7  ;;  %455 = vmatmul.msk.f32.vlgmr.msrb.gmra.mxu3 %vm253_vm0, %v99_v7 }
  0x41   :  { %311 = vmatpush.msrb.mxu2 %v106_v8 }
  0x43   :  { %312 = vmatpush.msrb.mxu2 %v102_v9 }
  0x47   :  { %454 = vmatmul.msk.f32.vlgmr.msrb.gmra.mxu2 %vm253_vm0, %v99_v7 }
  0xb4   :  { %v190_v10 = vpop.f32.mrf.mxu0 }
  0xb5   :  { %v210_v11 = vpop.f32.mrf.mxu1 }
  0xbb   :  { %v250_v13 = vpop.f32.mrf.mxu3 }
  0xbc   :  { %v274_v15 = vpop.f32.mrf.mxu0 }
  0xbd   :  { %v275_v17 = vadd.f32 %v274_v15, %v190_v10  ;;  %v294_v18 = vpop.f32.mrf.mxu1 }
  0xbe   :  { %v295_v19 = vadd.f32 %v294_v18, %v210_v11 }
  0xbf   :  { %v347_v20 = vadd.f32 %v339_v14, %v275_v17 }
  0xc0   :  { %v348_v21 = vadd.f32 %v340_v16, %v295_v19 }
  0xc1   :  { %v456_v22 = vmul.f32 -1.442695, %v347_v20 }
  0xc2   :  { %v457_v23 = vmul.f32 -1.442695, %v348_v21  ;;  %v230_v24 = vpop.f32.mrf.mxu2 }
  0xc3   :  { %468 = vpow2.f32 %v456_v22  ;;  %v334_v26 = vpop.f32.mrf.mxu3 }
  0xc4   :  { %470 = vpow2.f32 %v457_v23  ;;  %v335_v27 = vadd.f32 %v334_v26, %v250_v13 }
  0xc6   :  { %v350_v28 = vadd.f32 %v342_v25, %v335_v27 }
  0xc8   :  { %v458_v29 = vmul.f32 -1.442695, %v350_v28 }
  0xc9   :  { %v469_v30 = vpop.eup %468 }
  0xca   :  { %v471_v31 = vpop.eup %470  ;;  %v354_v32 = vadd.f32 1.0, %v469_v30  ;;  %472 = vpow2.f32 %v458_v29  ;;  %v314_v34 = vpop.f32.mrf.mxu2 }
  0xcb   :  { %v373_v33 = vadd.f32 1.0, %v471_v31  ;;  %v315_v35 = vadd.f32 %v314_v34, %v230_v24 }
  0xcc   :  { %474 = vrcp.f32 %v354_v32  ;;  %v366_v46 = vand.u32 2147483648, %v354_v32  ;;  %v364_v49 = vand.u32 2147483647, %v354_v32  ;;  %vm360_vm3 = vweird.f32 %v354_v32 }
  0xcd   :  { %476 = vrcp.f32 %v373_v33  ;;  %v349_v40 = vadd.f32 %v341_v36, %v315_v35  ;;  %v385_v47 = vand.u32 2147483648, %v373_v33  ;;  %v383_v51 = vand.u32 2147483647, %v373_v33 }
  0xce   :  { %vm379_vm4 = vweird.f32 %v373_v33  ;;  %v367_v54 = vor.u32 1.1754944e-38, %v366_v46  ;;  %vm365_vm7 = vcmp.eq.f32.partialorder %v364_v49, 8.507059e+37 }
  0xcf   :  { %v386_v57 = vor.u32 1.1754944e-38, %v385_v47  ;;  %vm384_vm8 = vcmp.eq.f32.partialorder %v383_v51, 8.507059e+37 }
  0xd0   :  { %v473_v37 = vpop.eup %472 }
  0xd1   :  { %v393_v38 = vadd.f32 1.0, %v473_v37 }
  0xd2   :  { %v475_v39 = vpop.eup %474 }
  0xd3   :  { %v477_v41 = vpop.eup %476  ;;  %v356_v42 = vmul.f32 %v475_v39, %v354_v32  ;;  %478 = vrcp.f32 %v393_v38  ;;  %vm361_vm1 = vweird.f32 %v475_v39  ;;  %v405_v6 = vand.u32 2147483648, %v393_v38 }
  0xd4   :  { %v375_v43 = vmul.f32 %v477_v41, %v373_v33  ;;  %480 = vtanh.f32 %v349_v40  ;;  %vm380_vm2 = vweird.f32 %v477_v41  ;;  %vm362_vm5 = vmor %vm360_vm3, %vm361_vm1  ;;  %vm399_vm10 = vweird.f32 %v393_v38 }
  0xd5   :  { %v357_v44 = vsub.f32 1.0, %v356_v42  ;;  %vm381_vm6 = vmor %vm379_vm4, %vm380_vm2  ;;  %v403_v7 = vand.u32 2147483647, %v393_v38  ;;  %v406_v9 = vor.u32 1.1754944e-38, %v405_v6 }
  0xd6   :  { %v376_v45 = vsub.f32 1.0, %v375_v43 }
  0xd7   :  { %v358_v48 = vmul.f32 %v475_v39, %v357_v44  ;;  %vm404_vm12 = vcmp.eq.f32.partialorder %v403_v7, 8.507059e+37 }
  0xd8   :  { %v377_v50 = vmul.f32 %v477_v41, %v376_v45 }
  0xd9   :  { %v479_v52 = vpop.eup %478  ;;  %v359_v53 = vadd.f32 %v475_v39, %v358_v48 }
  0xda   :  { %v378_v55 = vadd.f32 %v477_v41, %v377_v50  ;;  %v395_v56 = vmul.f32 %v479_v52, %v393_v38  ;;  %v481_v60 = vpop.eup %480  ;;  %vm400_vm9 = vweird.f32 %v479_v52 }
  0xdb   :  { %v363_v58 = vsel %vm362_vm5, %v475_v39, %v359_v53  ;;  %vm401_vm11 = vmor %vm399_vm10, %vm400_vm9 }
  0xdc   :  { %v368_v61 = vsel %vm365_vm7, %v367_v54, %v363_v58  ;;  %v382_v62 = vsel %vm381_vm6, %v477_v41, %v378_v55  ;;  %v396_v63 = vsub.f32 1.0, %v395_v56 }
  0xdd   :  { %v387_v0 = vsel %vm384_vm8, %v386_v57, %v382_v62  ;;  %v411_v1 = vmul.f32 %v481_v60, %v368_v61 }
  0xde   :  { %v410_v2 = vmul.f32 %v409_v59, %v387_v0  ;;  %v397_v3 = vmul.f32 %v479_v52, %v396_v63 }
  0xe0   :  { %v412_v4 = vadd.f32 %v411_v1, %v410_v2  ;;  %v398_v5 = vadd.f32 %v479_v52, %v397_v3 }
  0xe2   :  { %415 = vst [vmem:[#allocation12] sm:$0xff] %v412_v4  ;;  %482 = vtanh.f32 %v412_v4  ;;  %v402_v8 = vsel %vm401_vm11, %v479_v52, %v398_v5 }
  0xe3   :  { %438 = dma.vmem_to_hbm [thread:$0]  %s434_s25, 128, %s436_s28, [#allocation13]   ;;  %v407_v11 = vsel %vm404_vm12, %v406_v9, %v402_v8 }
  0xe8   :  { %v483_v10 = vpop.eup %482 }
  0xe9   :  { %v414_v12 = vmul.f32 %v483_v10, %v407_v11 }
  0xeb   :  { %416 = vst [vmem:[#allocation11] sm:$0xff] %v414_v12 }
  0xec   :  { %427 = dma.vmem_to_hbm [thread:$0]  %s423_s30, 128, %s425_s9, [#allocation4]  }
  0xed   :  { %658 = dma.done.wait [#allocation4], 128  }
  0xee   :  { %659 = vsyncadd [#allocation4], 4294967168 }
  0xef   :  { %660 = dma.done.wait [#allocation13], 128  }
  0xf0   :  { %661 = vsyncadd [#allocation13], 4294967168 }
  0xf1   :  { %447 = vsyncpa [#allocation3], 1 }
  0xf2   :  { %448 = vsyncpa [#allocation6], 1 }
  0xf3   :  { %449 = vsyncpa [#allocation9], 1 }
  0xf4   :  { %450 = vsyncpa [#allocation4], 1 }
  0xf5   :  { %451 = vsyncpa [#allocation13], 1 }

</bundles_post_ra>
